<compile_context>
chip_gen: v7x
topology: tpu7x:2x2x1
jax: 0.10.0
libtpu: 0.0.40
codegen_flags: <defaults>
</compile_context>

<pallas_src>
import functools

import jax
import jax.numpy as jnp
from jax import lax
from jax.experimental import pallas as pl
from jax.experimental.pallas import tpu as pltpu


# -----------------------------------------------------------------------------
# Generation-aware sizing (v5e/v6e: 128 MiB VMEM, 1 TC; v7x: 64 MiB, 2 TCs).
# -----------------------------------------------------------------------------
def _round_up(x, m):
    return ((x + m - 1) // m) * m


def _vmem_capacity_bytes():
    try:
        info = pltpu.get_tpu_info()
        for attr in ("vmem_capacity_bytes", "vmem_bytes", "vmem_size_bytes"):
            cap = getattr(info, attr, None)
            if cap:
                return int(cap)
    except Exception:
        pass
    return 64 * 1024 * 1024          # conservative (v7x-sized) fallback


def _compiler_params(dimension_semantics, vmem_cap):
    # Leave ~25% headroom for Mosaic internal scratch / double-buffering:
    # 48 MiB on v7x (64 MiB physical), 96 MiB on v5e/v6e (128 MiB physical).
    return pltpu.CompilerParams(
        dimension_semantics=dimension_semantics,
        vmem_limit_bytes=int(vmem_cap * 3 // 4))


# -----------------------------------------------------------------------------
# Fast path: num_iterations == 1  (softmax over zero logits is uniform 1/R).
# -----------------------------------------------------------------------------
def _single_iter_kernel(x_ref, w_ref, g_ref, out_ref, *, inv_r):
    # x_ref: (tb, K) bf16   w_ref: (K, Np) bf16   g_ref: (Np, Np) f32
    # out_ref: (tb, Np)  with Np = C*Cout rounded up to a multiple of 128 lanes.
    s = jnp.dot(x_ref[...], w_ref[...],
                preferred_element_type=jnp.float32) * inv_r          # (tb, Np)
    # Per-capsule squared norm, broadcast back over each capsule's lanes via a
    # block-diagonal ones matrix: stays lane-dense, no in-kernel reshapes.
    sqn = jnp.dot(s * s, g_ref[...], preferred_element_type=jnp.float32)
    # squash = ||v||^2/(1+||v||^2) * v/||v||; divide pushed to the EUP slot and
    # an epsilon keeps zero-norm / padded rows finite (no NaN).
    scale = sqn * pl.reciprocal(1.0 + sqn, approx=True) * lax.rsqrt(sqn + 1e-12)
    out_ref[...] = (s * scale).astype(out_ref.dtype)


def _forward_single_iter(x, route_weights, vmem_cap):
    B, R, Cin = x.shape
    C, _, _, Cout = route_weights.shape
    K, N = R * Cin, C * Cout
    Np = _round_up(N, 128)           # lane-dense output -> unmasked vst

    # bf16 operands halve HBM traffic on the streamed x and run the MXU
    # natively; accumulation stays f32 via preferred_element_type.
    x_flat = x.reshape(B, K).astype(jnp.bfloat16)
    # One-time wrapper layout: (C,R,Cin,Cout) -> (R,Cin,C,Cout) -> (K,N), padded.
    w_flat = jnp.transpose(route_weights, (1, 2, 0, 3)).reshape(K, N)
    w_flat = jnp.pad(w_flat, ((0, 0), (0, Np - N))).astype(jnp.bfloat16)
    # Block-diagonal ones (group-sum matrix for per-capsule squared norms);
    # zero outside the real N x N block so padded lanes stay exactly zero.
    gmat = jnp.zeros((Np, Np), jnp.float32).at[:N, :N].set(
        jnp.kron(jnp.eye(C, dtype=jnp.float32),
                 jnp.ones((Cout, Cout), dtype=jnp.float32)))

    # Generation-aware batch tile; keep >=2 parallel grid steps when the batch
    # allows so v7x's two TensorCores both get work (negligible cost on 1-TC
    # v5e/v6e parts).
    tb = min(B, 512 if vmem_cap >= 96 * 1024 * 1024 else 256)
    if B > 8 and pl.cdiv(B, tb) < 2:
        tb = max(8, _round_up(pl.cdiv(B, 2), 8))
    grid = (pl.cdiv(B, tb),)

    out = pl.pallas_call(
        functools.partial(_single_iter_kernel, inv_r=1.0 / R),
        out_shape=jax.ShapeDtypeStruct((B, Np), x.dtype),
        grid=grid,
        in_specs=[
            pl.BlockSpec((tb, K), lambda i: (i, 0)),
            # w_flat / gmat are grid-constant (constant block index => the DMA
            # is not re-issued).  pipeline_mode=pl.Buffered(1) would halve
            # their VMEM reservation if profiles show pressure.
            pl.BlockSpec((K, Np), lambda i: (0, 0)),
            pl.BlockSpec((Np, Np), lambda i: (0, 0)),
        ],
        out_specs=pl.BlockSpec((tb, Np), lambda i: (i, 0)),
        compiler_params=_compiler_params(("parallel",), vmem_cap),
    )(x_flat, w_flat, gmat)

    # (B, Np) lane-dense slab -> (C, B, 1, 1, Cout), dropping lane padding.
    return jnp.transpose(out[:, :N].reshape(B, C, Cout),
                         (1, 0, 2)).reshape(C, B, 1, 1, Cout)


# -----------------------------------------------------------------------------
# General path: num_iterations > 1 (full dynamic routing), R on the lane axis.
# -----------------------------------------------------------------------------
def _routing_kernel(x_ref, w_ref, out_ref, priors_ref, *, num_iterations, inv_r):
    # Lane-dense layout: the big route-node axis R is the trailing (lane) dim.
    #   x_ref:      (tb, Cin, R)
    #   w_ref:      (Cout, Cin, R)  per-capsule slab (capsule dim squeezed)
    #   out_ref:    (1, Cout, tb)   lane-dense in tb
    #   priors_ref: VMEM (Cout, tb, R) f32 scratch — written once, re-read each
    #               routing iteration, so the big priors tensor never has to
    #               stay live in vregs across the iteration loop.
    #               (Could be stored bf16 to halve VMEM if ever pressured.)
    tb, Cin, R = x_ref.shape
    Cout = w_ref.shape[0]

    # priors[o, b, r] = sum_c w[o, c, r] * x[b, c, r]
    # VPU broadcast-multiply-add over the tiny Cin axis (no MXU-padding waste),
    # accumulated in f32 and stored to scratch once.
    acc = jnp.zeros((Cout, tb, R), jnp.float32)
    for c in range(Cin):
        xc = x_ref[:, c, :].astype(jnp.float32)        # (tb, R)
        wc = w_ref[:, c, :].astype(jnp.float32)        # (Cout, R)
        acc = acc + wc[:, None, :] * xc[None, :, :]
    priors_ref[...] = acc

    def squash_caps(s):                                # s: (Cout, tb)
        sqn = jnp.sum(s * s, axis=0, keepdims=True)    # (1, tb)
        scale = sqn * pl.reciprocal(1.0 + sqn, approx=True)
        return s * (scale * lax.rsqrt(sqn + 1e-12))

    # Iteration 0: logits are all zeros -> softmax over R is uniform 1/R.
    outputs0 = squash_caps(jnp.sum(priors_ref[...], axis=-1) * inv_r)  # (Cout,tb)
    # delta_logits has no Cout dependence, so logits stay constant over Cout
    # for every iteration: track them as (tb, R) only (lane-dense in R).
    logits0 = jnp.zeros((tb, R), jnp.float32)

    def body(_, carry):
        logits, outputs = carry
        priors = priors_ref[...]
        # delta[b, r] = sum_o priors[o, b, r] * outputs[o, b]
        delta = jnp.sum(priors * outputs[:, :, None], axis=0)         # (tb, R)
        logits = logits + delta
        probs = jax.nn.softmax(logits, axis=-1)                       # lane softmax
        # s[o, b] = sum_r probs[b, r] * priors[o, b, r]
        s = jnp.sum(priors * probs[None, :, :], axis=-1)              # (Cout, tb)
        return logits, squash_caps(s)

    _, outputs = lax.fori_loop(1, num_iterations, body, (logits0, outputs0))
    out_ref[...] = outputs[None].astype(out_ref.dtype)


def _forward_routing(x, route_weights, num_iterations, vmem_cap):
    B, R, Cin = x.shape
    C, _, _, Cout = route_weights.shape

    # One-time wrapper re-layout so R is the lane axis inside the kernel.
    x_t = jnp.transpose(x, (0, 2, 1))                   # (B, Cin, R)
    w_t = jnp.transpose(route_weights, (0, 3, 2, 1))    # (C, Cout, Cin, R)

    tb = min(B, 256 if vmem_cap >= 96 * 1024 * 1024 else 128)
    grid = (C, pl.cdiv(B, tb))       # C >= 2 already feeds both v7x TCs

    out = pl.pallas_call(
        functools.partial(_routing_kernel,
                          num_iterations=num_iterations, inv_r=1.0 / R),
        out_shape=jax.ShapeDtypeStruct((C, Cout, B), x.dtype),
        grid=grid,
        in_specs=[
            pl.BlockSpec((tb, Cin, R), lambda c, i: (i, 0, 0)),
            # Per-capsule weight slab; capsule dim squeezed out of the kernel
            # view. (pipeline_mode=pl.Buffered(3) is an option if weight DMA
            # ever shows up exposed in profiles.)
            pl.BlockSpec((pl.Squeezed(), Cout, Cin, R),
                         lambda c, i: (c, 0, 0, 0)),
        ],
        out_specs=pl.BlockSpec((1, Cout, tb), lambda c, i: (c, 0, i)),
        scratch_shapes=[pltpu.VMEM((Cout, tb, R), jnp.float32)],
        compiler_params=_compiler_params(("parallel", "parallel"), vmem_cap),
    )(x_t, w_t)

    # (C, Cout, B) lane-dense slab -> (C, B, 1, 1, Cout)
    return jnp.transpose(out, (0, 2, 1)).reshape(C, B, 1, 1, Cout)


def capsule_layer_forward(x, route_weights, num_iterations=1):
    """Routing branch of CapsuleLayer.forward.  Returns [C, B, 1, 1, Cout]."""
    if num_iterations < 1:
        raise ValueError("num_iterations must be >= 1")
    B, R, Cin = x.shape
    C, R2, Cin2, Cout = route_weights.shape
    assert R == R2 and Cin == Cin2
    vmem_cap = _vmem_capacity_bytes()
    if num_iterations == 1:
        return _forward_single_iter(x, route_weights, vmem_cap)
    return _forward_routing(x, route_weights, num_iterations, vmem_cap)


# TODO(synk): conv-capsule branch (num_route_nodes == -1, list of Conv2d) not
# implemented here; only the routing branch (route_weights path) is exercised.


# -----------------------------------------------------------------------------
# Pure-JAX reference mirroring the PyTorch code exactly (f32, HIGHEST matmul).
# -----------------------------------------------------------------------------
def _squash_ref(t, axis=-1):
    sqn = jnp.sum(t * t, axis=axis, keepdims=True)
    return (sqn / (1.0 + sqn)) * t / jnp.sqrt(sqn)


def _capsule_layer_ref(x, route_weights, num_iterations=1):
    priors = jnp.matmul(x[None, :, :, None, :],
                        route_weights[:, None, :, :, :],
                        precision=lax.Precision.HIGHEST)
    logits = jnp.zeros_like(priors)
    outputs = None
    for i in range(num_iterations):
        probs = jax.nn.softmax(logits, axis=2)
        outputs = _squash_ref(jnp.sum(probs * priors, axis=2, keepdims=True),
                              axis=-1)
        if i != num_iterations - 1:
            delta = jnp.sum(priors * outputs, axis=-1, keepdims=True)
            logits = logits + delta
    return outputs


if __name__ == "__main__":
    # Small shapes: num_capsules=4, num_route_nodes=8, in_channels=8,
    # out_channels=16, batch=2.
    C, R, Cin, Cout, B = 4, 8, 8, 16, 2

    key = jax.random.PRNGKey(0)
    kx, kw = jax.random.split(key)
    x = jax.random.normal(kx, (B, R, Cin), dtype=jnp.float32)
    route_weights = jax.random.normal(kw, (C, R, Cin, Cout), dtype=jnp.float32)

    # Fast path (module default: num_iterations = 1).  The kernel uses bf16
    # MXU operands (f32 accumulation), so compare against the f32 HIGHEST
    # reference with a bf16-appropriate tolerance.
    out1 = jax.block_until_ready(capsule_layer_forward(x, route_weights, 1))
    ref1 = _capsule_layer_ref(x, route_weights, 1)
    assert out1.shape == (C, B, 1, 1, Cout), out1.shape
    assert jnp.allclose(out1, ref1, rtol=2e-2, atol=2e-2), \
        float(jnp.max(jnp.abs(out1 - ref1)))

    # General routing path (num_iterations = 3), f32 priors (approx-reciprocal
    # in the squash is the only approximation).
    out3 = jax.block_until_ready(capsule_layer_forward(x, route_weights, 3))
    ref3 = _capsule_layer_ref(x, route_weights, 3)
    assert out3.shape == (C, B, 1, 1, Cout), out3.shape
    assert jnp.allclose(out3, ref3, rtol=5e-3, atol=5e-3), \
        float(jnp.max(jnp.abs(out3 - ref3)))

    print("KERNEL_OK")
</pallas_src>

<mosaic_0001>
module attributes {stable_mosaic.version = 11 : i64} {
  func.func @_single_iter_kernel(%arg0: i32, %arg1: memref<2x64xbf16, #tpu.memory_space<vmem>>, %arg2: memref<64x128xbf16, #tpu.memory_space<vmem>>, %arg3: memref<128x128xf32, #tpu.memory_space<vmem>>, %arg4: memref<2x128xf32, #tpu.memory_space<vmem>>) attributes {dimension_semantics = [#tpu.dimension_semantics<parallel>], iteration_bounds = array<i64: 1>, scalar_prefetch = 0 : i64, scratch_operands = 0 : i64, tpu.core_type = #tpu.core_type<tc>, window_params = [{transform_indices = @transform_0, window_bounds = array<i64: 2, 64>}, {pipeline_mode = #tpu.pipeline_mode<synchronous>, transform_indices = @transform_1, window_bounds = array<i64: 64, 128>}, {pipeline_mode = #tpu.pipeline_mode<synchronous>, transform_indices = @transform_2, window_bounds = array<i64: 128, 128>}, {transform_indices = @transform_3, window_bounds = array<i64: 2, 128>}]} {
    %c0 = arith.constant 0 : index
    %c0_0 = arith.constant 0 : index
    %0 = vector.load %arg1[%c0, %c0_0] : memref<2x64xbf16, #tpu.memory_space<vmem>>, vector<2x64xbf16>
    %c0_1 = arith.constant 0 : index
    %c0_2 = arith.constant 0 : index
    %1 = vector.load %arg2[%c0_1, %c0_2] : memref<64x128xbf16, #tpu.memory_space<vmem>>, vector<64x128xbf16>
    %cst = arith.constant dense<0.000000e+00> : vector<2x128xf32>
    %2 = tpu.matmul %0, %1, %cst {dimension_numbers = #tpu.dot_dimension_numbers<[1], [0], [0], [1], [0, 0, 1, 1], [], []>} : vector<2x64xbf16>, vector<64x128xbf16>, vector<2x128xf32> -> vector<2x128xf32>
    %cst_3 = arith.constant 1.250000e-01 : f32
    %3 = vector.broadcast %cst_3 : f32 to vector<2x128xf32>
    %4 = arith.mulf %2, %3 : vector<2x128xf32>
    %5 = arith.mulf %4, %4 : vector<2x128xf32>
    %c0_4 = arith.constant 0 : index
    %c0_5 = arith.constant 0 : index
    %6 = vector.load %arg3[%c0_4, %c0_5] : memref<128x128xf32, #tpu.memory_space<vmem>>, vector<128x128xf32>
    %cst_6 = arith.constant dense<0.000000e+00> : vector<2x128xf32>
    %7 = tpu.matmul %5, %6, %cst_6 {dimension_numbers = #tpu.dot_dimension_numbers<[1], [0], [0], [1], [0, 0, 1, 1], [], []>} : vector<2x128xf32>, vector<128x128xf32>, vector<2x128xf32> -> vector<2x128xf32>
    %cst_7 = arith.constant 1.000000e+00 : f32
    %8 = vector.broadcast %cst_7 : f32 to vector<2x128xf32>
    %9 = arith.addf %8, %7 : vector<2x128xf32>
    %10 = tpu.reciprocal %9 {approx = true} : vector<2x128xf32> -> vector<2x128xf32>
    %11 = arith.mulf %7, %10 : vector<2x128xf32>
    %cst_8 = arith.constant 9.99999996E-13 : f32
    %12 = vector.broadcast %cst_8 : f32 to vector<2x128xf32>
    %13 = arith.addf %7, %12 : vector<2x128xf32>
    %14 = math.rsqrt %13 : vector<2x128xf32>
    %15 = arith.mulf %11, %14 : vector<2x128xf32>
    %16 = arith.mulf %4, %15 : vector<2x128xf32>
    %c0_9 = arith.constant 0 : index
    %c0_10 = arith.constant 0 : index
    %17 = vector.load %arg4[%c0_9, %c0_10] : memref<2x128xf32, #tpu.memory_space<vmem>>, vector<2x128xf32>
    tpu.vector_store %arg4[%c0_9, %c0_10], %16 {strides = array<i32>} : memref<2x128xf32, #tpu.memory_space<vmem>>, vector<2x128xf32>,
    return
  }
  func.func @transform_0(%arg0: i32) -> (i32, i32) {
    %c0_i32 = arith.constant 0 : i32
    %c0_i32_0 = arith.constant 0 : i32
    return %arg0, %c0_i32 : i32, i32
  }
  func.func @transform_1(%arg0: i32) -> (i32, i32) {
    %c0_i32 = arith.constant 0 : i32
    %c0_i32_0 = arith.constant 0 : i32
    %c0_i32_1 = arith.constant 0 : i32
    return %c0_i32, %c0_i32_0 : i32, i32
  }
  func.func @transform_2(%arg0: i32) -> (i32, i32) {
    %c0_i32 = arith.constant 0 : i32
    %c0_i32_0 = arith.constant 0 : i32
    %c0_i32_1 = arith.constant 0 : i32
    return %c0_i32, %c0_i32_0 : i32, i32
  }
  func.func @transform_3(%arg0: i32) -> (i32, i32) {
    %c0_i32 = arith.constant 0 : i32
    %c0_i32_0 = arith.constant 0 : i32
    return %arg0, %c0_i32 : i32, i32
  }
}

</mosaic_0001>

<bundles_post_ra>
// kernel: tpu_custom_call.1
= control target key start
LH: loop header
LB: loop body
LE: loop exit
PB: predicated region body
PF: predicated region fallthrough
CT: control target
= control target key end

     0   :  { %8 = vsyncpa [#allocation3], 0  ;;  %s534_s0 = inlined_call_operand.hbm [shape: bf16[2,64], index: 0, kind: input, shape index: {}]   ;;  %s535_s1 = inlined_call_operand.hbm [shape: bf16[64,128], index: 1, kind: input, shape index: {}]   ;;  %s536_s2 = inlined_call_operand.hbm [shape: f32[128,128], index: 2, kind: input, shape index: {}]   ;;  %s537_s3 = inlined_call_operand.hbm [shape: f32[2,128], index: 3, kind: output, shape index: {}]  }
   0x1   :  { %9 = vsyncpa [#allocation6], 0 }
   0x2   :  { %10 = vsyncpa [#allocation4], 0  ;;  %s455_s12 = smov [#allocation5]   ;;  %s361_s16 = scalar_lea.hbm %s535_s1, 512 }
   0x3   :  { %s26_s13 = sshll.u32 %s455_s12, 4  ;;  %p362_p0 = scmp.ne.s32.totalorder %s535_s1, %s361_s16  ;;  %s27_s13 = int_to_ptr.vmem [resolvable:$true] %s26_s13 }
   0x4   :  { %p365_p1 = scmp.lt.u32.totalorder %s361_s16, %s535_s1 }
   0x6   :  { %p367_p2 = pnand %p365_p1, %p362_p0 }
   0x8   :  { %370 = shalt.err (!%p367_p2)
}
   0x9   :  { %s371_s21 = scalar_lea.vmem %s27_s13, 512  ;;  %p376_p4 = scmp.lt.s32.totalorder %s27_s13, %s27_s13 }
   0xa   :  { %p372_p3 = scmp.ne.s32.totalorder %s27_s13, %s371_s21  ;;  %p377_p5 = scmp.lt.s32.totalorder %s371_s21, %s371_s21 }
   0xc   :  { %p378_p6 = por %p377_p5, %p376_p4 }
   0xe   :  { %p379_p7 = pnand %p378_p6, %p372_p3 }
  0x10   :  { %382 = shalt.err (!%p379_p7)
}
  0x11   :  { %s456_s22 = smov 64   ;;  %s457_s23 = smov 4  }
  0x12   :  { %32 = dma.hbm_to_vmem [thread:$0]  %s535_s1, 512, %s27_s13, [#allocation6], %s456_s22, %s456_s22, %s457_s23  }
  0x13   :  { %s458_s26 = smov [#allocation2]   ;;  %s459_s28 = smov [#allocation7]  }
  0x14   :  { %s17_s27 = sshll.u32 %s458_s26, 4  ;;  %s38_s29 = sshll.u32 %s459_s28, 4  ;;  %s18_s27 = int_to_ptr.vmem [resolvable:$true] %s17_s27  ;;  %s39_s29 = int_to_ptr.vmem [resolvable:$true] %s38_s29 }
  0x15   :  { %s383_s5 = scalar_lea.hbm %s534_s0, 16 }
  0x16   :  { %p384_p8 = scmp.ne.s32.totalorder %s534_s0, %s383_s5  ;;  %p387_p9 = scmp.lt.u32.totalorder %s383_s5, %s534_s0 }
  0x18   :  { %p389_p10 = pnand %p387_p9, %p384_p8 }
  0x1a   :  { %392 = shalt.err (!%p389_p10)
}
  0x1b   :  { %s393_s1 = scalar_lea.vmem %s18_s27, 16  ;;  %s397_s10 = scalar_lea.vmem %s18_s27, 32 }
  0x1c   :  { %p394_p11 = scmp.ne.s32.totalorder %s18_s27, %s393_s1  ;;  %p398_p12 = scmp.lt.s32.totalorder %s18_s27, %s18_s27 }
  0x1d   :  { %p399_p13 = scmp.lt.s32.totalorder %s397_s10, %s393_s1 }
  0x1f   :  { %p400_p0 = por %p399_p13, %p398_p12 }
  0x21   :  { %p401_p1 = pnand %p400_p0, %p394_p11 }
  0x23   :  { %404 = shalt.err (!%p401_p1)
}
  0x24   :  { %20 = dma.hbm_to_vmem [thread:$0]  %s534_s0, 16, %s18_s27, [#allocation3]  }
  0x25   :  { %s405_s15 = scalar_lea.hbm %s536_s2, 2048 }
  0x26   :  { %p406_p2 = scmp.ne.s32.totalorder %s536_s2, %s405_s15  ;;  %p409_p3 = scmp.lt.u32.totalorder %s405_s15, %s536_s2 }
  0x28   :  { %p411_p4 = pnand %p409_p3, %p406_p2 }
  0x2a   :  { %414 = shalt.err (!%p411_p4)
}
  0x2b   :  { %s415_s20 = scalar_lea.vmem %s39_s29, 2048  ;;  %p420_p6 = scmp.lt.s32.totalorder %s39_s29, %s39_s29 }
  0x2c   :  { %p416_p5 = scmp.ne.s32.totalorder %s39_s29, %s415_s20  ;;  %p421_p7 = scmp.lt.s32.totalorder %s415_s20, %s415_s20 }
  0x2e   :  { %p422_p8 = por %p421_p7, %p420_p6 }
  0x30   :  { %p423_p9 = pnand %p422_p8, %p416_p5 }
  0x32   :  { %426 = shalt.err (!%p423_p9)
}
  0x33   :  { %s460_s0 = smov 128   ;;  %s461_s21 = smov 8  }
  0x34   :  { %44 = dma.hbm_to_vmem [thread:$0]  %s536_s2, 2048, %s39_s29, [#allocation6], %s460_s0, %s460_s0, %s461_s21  }
  0x35   :  { %449 = dma.done.wait [#allocation3], 16  }
  0x36   :  { %450 = vsyncadd [#allocation3], 4294967280 }
  0x37   :  { %451 = dma.done.wait [#allocation6], 2560  }
  0x38   :  { %452 = vsyncadd [#allocation6], 4294964736  ;;  %v462_v0 = vmov 0.0   ;;  %vm463_vm0 = vmmov 0   ;;  %v464_v1 = vmov 0.0|0.0   ;;  %v353_v2 = vld [vmem:[#allocation5] sm:$0xff]  }
  0x39   :  { %271 = vmatprep.subr.bf16.mxu0 %v462_v0  ;;  %279 = vmatprep.mubr.msk.bf16.mxu0 %vm463_vm0, %v462_v0  ;;  %v354_v3 = vld [vmem:[#allocation5 + $0x8] sm:$0xff]   ;;  %v134_v4 = vld [vmem:[#allocation7] sm:$0xff]  ;;  %v136_v7 = vld [vmem:[#allocation7 + $0x10] sm:$0xff]  ;;  %vm88_vm1 = vcmask 523264   ;;  %s465_s2 = smov [#allocation8]  }
  0x3a   :  { %318 = vmatprep.subr.bf16.mxu1 %v464_v1  ;;  %315 = vmatprep.mubr.msk.f32.mxu1 %vm463_vm0, %v462_v0  ;;  %v135_v5 = vld [vmem:[#allocation7 + $0x8] sm:$0xff]  ;;  %v137_v8 = vld [vmem:[#allocation7 + $0x18] sm:$0xff]  ;;  %v355_v9 = vld [vmem:[#allocation5 + $0x10] sm:$0xff]   ;;  %s234_s24 = sshll.u32 %s465_s2, 4  ;;  %s235_s24 = int_to_ptr.vmem [resolvable:$true] %s234_s24 }
  0x3b   :  { %272 = vmatpush3.bf16.msra.mxu0 %v353_v2  ;;  %v319_v6 = vpack.c.bf16 %v135_v5, %v134_v4  ;;  %v322_v10 = vpack.c.bf16 %v137_v8, %v136_v7  ;;  %v138_v11 = vld [vmem:[#allocation7 + $0x20] sm:$0xff]  ;;  %v139_v12 = vld [vmem:[#allocation7 + $0x28] sm:$0xff]  ;;  %v356_v13 = vld [vmem:[#allocation5 + $0x18] sm:$0xff]   ;;  %s427_s25 = scalar_lea.vmem %s235_s24, 32  ;;  %p432_p11 = scmp.lt.s32.totalorder %s235_s24, %s235_s24 }
  0x3c   :  { %273 = vmatprep.subr.bf16.mxu0 %v462_v0  ;;  %v325_v14 = vpack.c.bf16 %v139_v12, %v138_v11  ;;  %v140_v15 = vld [vmem:[#allocation7 + $0x30] sm:$0xff]  ;;  %v141_v16 = vld [vmem:[#allocation7 + $0x38] sm:$0xff]  ;;  %v142_v19 = vld [vmem:[#allocation7 + $0x40] sm:$0xff]  ;;  %p428_p10 = scmp.ne.s32.totalorder %s235_s24, %s427_s25  ;;  %p433_p12 = scmp.lt.s32.totalorder %s427_s25, %s427_s25 }
  0x3d   :  { %320 = vmatpush3.bf16.msra.mxu1 %v319_v6  ;;  %v55_v17 = vld [vmem:[#allocation2] sm:$0x1]  ;;  %v328_v18 = vpack.c.bf16 %v141_v16, %v140_v15  ;;  %v143_v20 = vld [vmem:[#allocation7 + $0x48] sm:$0xff]  ;;  %v144_v22 = vld [vmem:[#allocation7 + $0x50] sm:$0xff] }
  0x3e   :  { %321 = vmatprep.subr.bf16.mxu1 %v464_v1  ;;  %v331_v21 = vpack.c.bf16 %v143_v20, %v142_v19  ;;  %v145_v23 = vld [vmem:[#allocation7 + $0x58] sm:$0xff]  ;;  %v146_v25 = vld [vmem:[#allocation7 + $0x60] sm:$0xff]  ;;  %v147_v26 = vld [vmem:[#allocation7 + $0x68] sm:$0xff]  ;;  %p434_p13 = por %p433_p12, %p432_p11 }
  0x3f   :  { %274 = vmatpush3.bf16.msra.mxu0 %v354_v3  ;;  %v334_v24 = vpack.c.bf16 %v145_v23, %v144_v22  ;;  %v337_v27 = vpack.c.bf16 %v147_v26, %v146_v25  ;;  %v148_v28 = vld [vmem:[#allocation7 + $0x70] sm:$0xff]  ;;  %v149_v29 = vld [vmem:[#allocation7 + $0x78] sm:$0xff] }
  0x40   :  { %275 = vmatprep.subr.bf16.mxu0 %v462_v0  ;;  %v340_v30 = vpack.c.bf16 %v149_v29, %v148_v28  ;;  %p435_p0 = pnand %p434_p13, %p428_p10 }
  0x41   :  { %323 = vmatpush3.bf16.msra.mxu1 %v322_v10 }
  0x42   :  { %324 = vmatprep.subr.bf16.mxu1 %v464_v1 }
  0x43   :  { %276 = vmatpush3.bf16.msra.mxu0 %v355_v9 }
  0x44   :  { %277 = vmatprep.subr.bf16.mxu0 %v462_v0 }
  0x45   :  { %326 = vmatpush3.bf16.msra.mxu1 %v325_v14 }
  0x46   :  { %327 = vmatprep.subr.bf16.mxu1 %v464_v1 }
  0x47   :  { %278 = vmatpush3.bf16.msra.mxu0 %v356_v13 }
  0x49   :  { %329 = vmatpush3.bf16.msra.mxu1 %v328_v18 }
  0x4a   :  { %280 = vmatmul.mubr.msk.bf16.vlgmr.msra.gmra.mrb[0].mxu0 %vm88_vm1, %v55_v17  ;;  %330 = vmatprep.subr.bf16.mxu1 %v464_v1 }
  0x4d   :  { %332 = vmatpush3.bf16.msra.mxu1 %v331_v21 }
  0x4e   :  { %333 = vmatprep.subr.bf16.mxu1 %v464_v1 }
  0x51   :  { %335 = vmatpush3.bf16.msra.mxu1 %v334_v24 }
  0x52   :  { %336 = vmatprep.subr.bf16.mxu1 %v464_v1 }
  0x55   :  { %338 = vmatpush3.bf16.msra.mxu1 %v337_v27 }
  0x56   :  { %339 = vmatprep.subr.bf16.mxu1 %v464_v1 }
  0x59   :  { %341 = vmatpush3.bf16.msra.mxu1 %v340_v30 }
 0x11d   :  { %v126_v31 = vpop.f32.mrb[0].mxu0 }
 0x11e   :  { %v132_v32 = vmul.f32 0.125, %v126_v31  ;;  %v281_v33 = vpop.f32.mrb[1].mxu0 }
 0x11f   :  { %v129_v34 = vpop.f32.mrb[2].mxu0 }
 0x120   :  { %v133_v35 = vmul.f32 %v132_v32, %v132_v32  ;;  %v282_v36 = vpop.f32.mrb[3].mxu0 }
 0x122   :  { %316 = vmatmul.mubr.f32.vlgmr.msra.gmra.mrb[0].mxu1 %v133_v35 }
 0x1f5   :  { %v216_v37 = vpop.f32.mrb[0].mxu1 }
 0x1f6   :  { %v220_v38 = vadd.f32 1.0, %v216_v37  ;;  %v223_v39 = vadd.f32 1e-12, %v216_v37  ;;  %v317_v40 = vpop.f32.mrb[1].mxu1 }
 0x1f8   :  { %357 = vrcp.f32 %v220_v38 }
 0x1f9   :  { %359 = vrsqrt.f32 %v223_v39 }
 0x202   :  { %v358_v41 = vpop.eup %357 }
 0x203   :  { %v222_v42 = vmul.f32 %v358_v41, %v216_v37  ;;  %v360_v43 = vpop.eup %359 }
 0x205   :  { %v225_v44 = vmul.f32 %v360_v43, %v222_v42 }
 0x207   :  { %v226_v45 = vmul.f32 %v225_v44, %v132_v32 }
 0x209   :  { %227 = vst [vmem:[#allocation8] sm:$0x3] %v226_v45 }
 0x20a   :  { %438 = shalt.err (!%p435_p0)
}
 0x20b   :  { %s439_s28 = scalar_lea.hbm %s537_s3, 32 }
 0x20c   :  { %p440_p1 = scmp.ne.s32.totalorder %s537_s3, %s439_s28  ;;  %p443_p2 = scmp.lt.u32.totalorder %s439_s28, %s537_s3 }
 0x20e   :  { %p445_p3 = pnand %p443_p2, %p440_p1 }
 0x210   :  { %448 = shalt.err (!%p445_p3)
}
 0x211   :  { %237 = dma.vmem_to_hbm [thread:$0]  %s235_s24, 32, %s537_s3, [#allocation4]  }
 0x212   :  { %453 = dma.done.wait [#allocation4], 32  }
 0x213   :  { %454 = vsyncadd [#allocation4], 4294967264 }
 0x214   :  { %241 = vsyncpa [#allocation3], 1 }
 0x215   :  { %242 = vsyncpa [#allocation6], 1 }
 0x216   :  { %243 = vsyncpa [#allocation4], 1 }

</bundles_post_ra>
